<compile_context>
chip_gen: v5e
topology: v5e:2x2
jax: 0.10.0
libtpu: 0.0.40
codegen_flags: <defaults>
</compile_context>

<pallas_src>
import jax
import jax.numpy as jnp
from jax.experimental import pallas as pl
from jax.experimental.pallas import tpu as pltpu

# Pendulum-v1 constants (obs dim 3, action dim 1, action bound 2.0)
STATE_DIM = 3
ACTION_DIM = 1
HIDDEN_DIM = 64
HIDDEN_PAD = 128      # pad hidden to one full vreg lane width
ACTION_BOUND = 2.0


def _round_up(v, m):
    return ((v + m - 1) // m) * m


def policy_net_kernel(xt_ref, w1_ref, b1_ref, w2_ref, o_ref):
    # xt_ref: [STATE_DIM, tb]           VMEM, streamed per grid step (lane-dense)
    # w1_ref: [HIDDEN_PAD, STATE_DIM]   VMEM, resident across the grid
    # b1_ref: [HIDDEN_PAD, 1]           VMEM, resident (slot HIDDEN_DIM == 1.0)
    # w2_ref: [HIDDEN_PAD, 1]           VMEM, resident (slot HIDDEN_DIM == b2)
    # o_ref : [1, tb]                   VMEM, lane-dense output row
    xt = xt_ref[...]                    # [3, tb]
    w1 = w1_ref[...]                    # [128, 3]

    # fc1 as STATE_DIM exact-f32 VPU FMAs (K=3 -> MXU not worth it; exact numerics).
    h = b1_ref[...]                     # [128, 1], broadcasts along lanes
    for k in range(STATE_DIM):
        h = h + w1[:, k:k + 1] * xt[k:k + 1, :]    # [128,1]*[1,tb] -> [128,tb]
    h = jnp.maximum(h, 0.0)             # [128, tb]

    # fc2 (+ folded b2): VPU multiply then sublane reduce over the hidden axis.
    y = jnp.sum(h * w2_ref[...], axis=0, keepdims=True)       # [1, tb]
    o_ref[...] = (jnp.tanh(y) * ACTION_BOUND).astype(o_ref.dtype)


def prepare_params(w1, b1, w2, b2):
    """One-time transform from PyTorch nn.Linear layout to kernel layout.

    Torch layout: w1 [HIDDEN_DIM, STATE_DIM], b1 [HIDDEN_DIM],
                  w2 [ACTION_DIM, HIDDEN_DIM], b2 [ACTION_DIM].
    Hoisted out of the per-call path so inference steps pay no weight-prep cost.
    """
    w1p = jnp.zeros((HIDDEN_PAD, STATE_DIM), jnp.float32)
    w1p = w1p.at[:HIDDEN_DIM, :].set(w1.astype(jnp.float32))
    b1p = jnp.zeros((HIDDEN_PAD, 1), jnp.float32)
    b1p = b1p.at[:HIDDEN_DIM, 0].set(b1.astype(jnp.float32))
    # Fold b2 into the reduction: hidden slot HIDDEN_DIM carries a constant 1.0
    # through ReLU and multiplies b2 in the fc2 reduce.  Remaining padded slots
    # have zero weights on both sides, so they contribute nothing.
    b1p = b1p.at[HIDDEN_DIM, 0].set(1.0)
    w2p = jnp.zeros((HIDDEN_PAD, 1), jnp.float32)
    w2p = w2p.at[:HIDDEN_DIM, 0].set(w2.reshape(-1).astype(jnp.float32))
    w2p = w2p.at[HIDDEN_DIM, 0].set(jnp.asarray(b2, jnp.float32).reshape(()))
    return w1p, b1p, w2p


def policy_net_forward(x, params, *, block_b=2048):
    """x: [B, STATE_DIM] -> [B, ACTION_DIM].  params = prepare_params(...)."""
    w1p, b1p, w2p = params
    B = x.shape[0]
    xt = x.astype(jnp.float32).T                      # [STATE_DIM, B], batch on lanes

    # Batch tile: multiple of 128 (lane width).  Cap so the grid has >= 2 steps
    # for larger batches (v7x megacore sharding via "parallel"); pad B so the
    # grid divides exactly (padded columns are sliced off afterwards).
    b_lane = _round_up(max(B, 1), 128)
    tb = min(_round_up(block_b, 128), b_lane)
    if b_lane > 128:
        tb = min(tb, max(128, _round_up(pl.cdiv(b_lane, 2), 128)))
    b_pad = _round_up(b_lane, tb)
    if b_pad != B:
        xt = jnp.pad(xt, ((0, 0), (0, b_pad - B)))

    out = pl.pallas_call(
        policy_net_kernel,
        out_shape=jax.ShapeDtypeStruct((1, b_pad), jnp.float32),
        grid=(b_pad // tb,),
        in_specs=[
            pl.BlockSpec((STATE_DIM, tb), lambda i: (0, i)),          # x: streamed, lane-dense
            pl.BlockSpec((HIDDEN_PAD, STATE_DIM), lambda i: (0, 0)),  # w1: resident
            pl.BlockSpec((HIDDEN_PAD, 1), lambda i: (0, 0)),          # b1 (+1.0 slot): resident
            pl.BlockSpec((HIDDEN_PAD, 1), lambda i: (0, 0)),          # w2 (+b2 slot): resident
        ],
        out_specs=pl.BlockSpec((1, tb), lambda i: (0, i)),            # lane-dense store
        compiler_params=pltpu.CompilerParams(
            dimension_semantics=("parallel",),
        ),
    )(xt, w1p, b1p, w2p)
    return out[0, :B][:, None]                        # [B, ACTION_DIM]


def init_params(key):
    """torch.nn.Linear-style init: U(-1/sqrt(fan_in), +1/sqrt(fan_in)), torch layout."""
    k1, k2, k3, k4 = jax.random.split(key, 4)
    bound1 = 1.0 / jnp.sqrt(STATE_DIM)
    bound2 = 1.0 / jnp.sqrt(HIDDEN_DIM)
    w1 = jax.random.uniform(k1, (HIDDEN_DIM, STATE_DIM), jnp.float32, -bound1, bound1)
    b1 = jax.random.uniform(k2, (HIDDEN_DIM,), jnp.float32, -bound1, bound1)
    w2 = jax.random.uniform(k3, (ACTION_DIM, HIDDEN_DIM), jnp.float32, -bound2, bound2)
    b2 = jax.random.uniform(k4, (ACTION_DIM,), jnp.float32, -bound2, bound2)
    return w1, b1, w2, b2


def reference_forward(x, w1, b1, w2, b2):
    h = jnp.maximum(
        jnp.matmul(x, w1.T, precision=jax.lax.Precision.HIGHEST) + b1, 0.0)
    y = jnp.matmul(h, w2.T, precision=jax.lax.Precision.HIGHEST) + b2
    return jnp.tanh(y) * ACTION_BOUND


if __name__ == "__main__":
    key = jax.random.PRNGKey(0)
    kx1, kx2, kp = jax.random.split(key, 3)

    w1, b1, w2, b2 = init_params(kp)
    params = prepare_params(w1, b1, w2, b2)   # one-time weight prep (hoisted)

    # Small actor-style batch (single tile, padded to 128 lanes).
    batch = 8
    x = jax.random.normal(kx1, (batch, STATE_DIM), dtype=jnp.float32)
    out = jax.block_until_ready(policy_net_forward(x, w1_p := params))
    ref = reference_forward(x, w1, b1, w2, b2)
    assert out.shape == (batch, ACTION_DIM)
    assert jnp.allclose(out, ref, atol=1e-4, rtol=1e-4), "mismatch vs reference (B=8)"

    # Batch that exercises padding + a 2-step grid (v7x megacore path).
    batch2 = 200
    x2 = jax.random.normal(kx2, (batch2, STATE_DIM), dtype=jnp.float32)
    out2 = jax.block_until_ready(policy_net_forward(x2, params))
    ref2 = reference_forward(x2, w1, b1, w2, b2)
    assert out2.shape == (batch2, ACTION_DIM)
    assert jnp.allclose(out2, ref2, atol=1e-4, rtol=1e-4), "mismatch vs reference (B=200)"

    print("KERNEL_OK")
</pallas_src>

<mosaic_0001>
module attributes {stable_mosaic.version = 11 : i64} {
  func.func @policy_net_kernel(%arg0: i32, %arg1: memref<3x128xf32, #tpu.memory_space<vmem>>, %arg2: memref<128x3xf32, #tpu.memory_space<vmem>>, %arg3: memref<128x1xf32, #tpu.memory_space<vmem>>, %arg4: memref<128x1xf32, #tpu.memory_space<vmem>>, %arg5: memref<1x128xf32, #tpu.memory_space<vmem>>) attributes {dimension_semantics = [#tpu.dimension_semantics<parallel>], iteration_bounds = array<i64: 1>, scalar_prefetch = 0 : i64, scratch_operands = 0 : i64, tpu.core_type = #tpu.core_type<tc>, window_params = [{transform_indices = @transform_0, window_bounds = array<i64: 3, 128>}, {pipeline_mode = #tpu.pipeline_mode<synchronous>, transform_indices = @transform_1, window_bounds = array<i64: 128, 3>}, {pipeline_mode = #tpu.pipeline_mode<synchronous>, transform_indices = @transform_2, window_bounds = array<i64: 128, 1>}, {pipeline_mode = #tpu.pipeline_mode<synchronous>, transform_indices = @transform_3, window_bounds = array<i64: 128, 1>}, {transform_indices = @transform_4, window_bounds = array<i64: 1, 128>}]} {
    %c0 = arith.constant 0 : index
    %c0_0 = arith.constant 0 : index
    %0 = vector.load %arg1[%c0, %c0_0] : memref<3x128xf32, #tpu.memory_space<vmem>>, vector<3x128xf32>
    %c0_1 = arith.constant 0 : index
    %c0_2 = arith.constant 0 : index
    %1 = vector.load %arg2[%c0_1, %c0_2] : memref<128x3xf32, #tpu.memory_space<vmem>>, vector<128x3xf32>
    %c0_3 = arith.constant 0 : index
    %c0_4 = arith.constant 0 : index
    %2 = vector.load %arg3[%c0_3, %c0_4] : memref<128x1xf32, #tpu.memory_space<vmem>>, vector<128x1xf32>
    %3 = vector.extract_strided_slice %1 {offsets = [0, 0], sizes = [128, 1], strides = [1, 1]} : vector<128x3xf32> to vector<128x1xf32>
    %4 = vector.extract_strided_slice %0 {offsets = [0, 0], sizes = [1, 128], strides = [1, 1]} : vector<3x128xf32> to vector<1x128xf32>
    %5 = vector.broadcast %3 : vector<128x1xf32> to vector<128x128xf32>
    %6 = vector.broadcast %4 : vector<1x128xf32> to vector<128x128xf32>
    %7 = arith.mulf %5, %6 : vector<128x128xf32>
    %8 = vector.broadcast %2 : vector<128x1xf32> to vector<128x128xf32>
    %9 = arith.addf %8, %7 : vector<128x128xf32>
    %10 = vector.extract_strided_slice %1 {offsets = [0, 1], sizes = [128, 1], strides = [1, 1]} : vector<128x3xf32> to vector<128x1xf32>
    %11 = vector.extract_strided_slice %0 {offsets = [1, 0], sizes = [1, 128], strides = [1, 1]} : vector<3x128xf32> to vector<1x128xf32>
    %12 = vector.broadcast %10 : vector<128x1xf32> to vector<128x128xf32>
    %13 = vector.broadcast %11 : vector<1x128xf32> to vector<128x128xf32>
    %14 = arith.mulf %12, %13 : vector<128x128xf32>
    %15 = arith.addf %9, %14 : vector<128x128xf32>
    %16 = vector.extract_strided_slice %1 {offsets = [0, 2], sizes = [128, 1], strides = [1, 1]} : vector<128x3xf32> to vector<128x1xf32>
    %17 = vector.extract_strided_slice %0 {offsets = [2, 0], sizes = [1, 128], strides = [1, 1]} : vector<3x128xf32> to vector<1x128xf32>
    %18 = vector.broadcast %16 : vector<128x1xf32> to vector<128x128xf32>
    %19 = vector.broadcast %17 : vector<1x128xf32> to vector<128x128xf32>
    %20 = arith.mulf %18, %19 : vector<128x128xf32>
    %21 = arith.addf %15, %20 : vector<128x128xf32>
    %cst = arith.constant 0.000000e+00 : f32
    %22 = vector.broadcast %cst : f32 to vector<128x128xf32>
    %23 = arith.maximumf %21, %22 : vector<128x128xf32>
    %c0_5 = arith.constant 0 : index
    %c0_6 = arith.constant 0 : index
    %24 = vector.load %arg4[%c0_5, %c0_6] : memref<128x1xf32, #tpu.memory_space<vmem>>, vector<128x1xf32>
    %25 = vector.broadcast %24 : vector<128x1xf32> to vector<128x128xf32>
    %26 = arith.mulf %23, %25 : vector<128x128xf32>
    %cst_7 = arith.constant dense<0.000000e+00> : vector<128xf32>
    %27 = vector.multi_reduction <add>, %26, %cst_7 [0] : vector<128x128xf32> to vector<128xf32>
    %28 = vector.shape_cast %27 : vector<128xf32> to vector<1x128xf32>
    %29 = math.tanh %28 : vector<1x128xf32>
    %cst_8 = arith.constant 2.000000e+00 : f32
    %30 = vector.broadcast %cst_8 : f32 to vector<1x128xf32>
    %31 = arith.mulf %29, %30 : vector<1x128xf32>
    %c0_9 = arith.constant 0 : index
    %c0_10 = arith.constant 0 : index
    %32 = vector.load %arg5[%c0_9, %c0_10] : memref<1x128xf32, #tpu.memory_space<vmem>>, vector<1x128xf32>
    tpu.vector_store %arg5[%c0_9, %c0_10], %31 {strides = array<i32>} : memref<1x128xf32, #tpu.memory_space<vmem>>, vector<1x128xf32>,
    return
  }
  func.func @transform_0(%arg0: i32) -> (i32, i32) {
    %c0_i32 = arith.constant 0 : i32
    %c0_i32_0 = arith.constant 0 : i32
    return %c0_i32, %arg0 : i32, i32
  }
  func.func @transform_1(%arg0: i32) -> (i32, i32) {
    %c0_i32 = arith.constant 0 : i32
    %c0_i32_0 = arith.constant 0 : i32
    %c0_i32_1 = arith.constant 0 : i32
    return %c0_i32, %c0_i32_0 : i32, i32
  }
  func.func @transform_2(%arg0: i32) -> (i32, i32) {
    %c0_i32 = arith.constant 0 : i32
    %c0_i32_0 = arith.constant 0 : i32
    %c0_i32_1 = arith.constant 0 : i32
    return %c0_i32, %c0_i32_0 : i32, i32
  }
  func.func @transform_3(%arg0: i32) -> (i32, i32) {
    %c0_i32 = arith.constant 0 : i32
    %c0_i32_0 = arith.constant 0 : i32
    %c0_i32_1 = arith.constant 0 : i32
    return %c0_i32, %c0_i32_0 : i32, i32
  }
  func.func @transform_4(%arg0: i32) -> (i32, i32) {
    %c0_i32 = arith.constant 0 : i32
    %c0_i32_0 = arith.constant 0 : i32
    return %c0_i32, %arg0 : i32, i32
  }
}

</mosaic_0001>

<bundles_post_ra>
// kernel: tpu_custom_call.1
= control target key start
LH: loop header
LB: loop body
LE: loop exit
PB: predicated region body
PF: predicated region fallthrough
CT: control target
= control target key end

     0   :  { %v649_v3 = vmov 1   ;;  %v650_v4 = vmov 0   ;;  %s1066_s0 = inlined_call_operand.vmem [shape: f32[3,128], index: 0, kind: input, shape index: {}]   ;;  %s1067_s1 = inlined_call_operand.vmem [shape: f32[128,3], index: 1, kind: input, shape index: {}]   ;;  %s1068_s2 = inlined_call_operand.vmem [shape: f32[128,1], index: 2, kind: input, shape index: {}]   ;;  %s1069_s3 = inlined_call_operand.vmem [shape: f32[128,1], index: 3, kind: input, shape index: {}]   ;;  %s1070_s4 = inlined_call_operand.hbm [shape: f32[1,128], index: 4, kind: output, shape index: {}]  }
   0x1   :  { %v681_v0 = vld [vmem:[%s1067_s1 + $0x20] sm:$0xff]  ;;  %v686_v1 = vld [vmem:[%s1067_s1 + $0x10] sm:$0xff]  ;;  %v691_v2 = vld [vmem:[%s1067_s1 + $0x8] sm:$0xff]  ;;  %613 = vset.pattern.permute.xlu0 %v649_v3  ;;  %611 = vset.pattern.permute.xlu2 %v650_v4 }
   0x2   :  { %610 = vset.pattern.permute.xlu1 %v650_v4  ;;  %73 = vperm.xlu2 %611, %v681_v0  }
   0x3   :  { %63 = vperm.xlu1 %610, %v686_v1   ;;  %249 = vperm.xlu0 %613, %v691_v2  }
   0x4   :  { %9 = vsyncpa [#allocation3], 0  ;;  %v702_v5 = vld [vmem:[%s1067_s1 + $0x28] sm:$0xff]  ;;  %v707_v6 = vld [vmem:[%s1067_s1 + $0x18] sm:$0xff]  ;;  %v651_v19 = vmov 2   ;;  %s597_s6 = sshll.u32 %s1070_s4, 4  ;;  %s598_s6 = int_to_ptr.hbm [resolvable:$true] %s597_s6 }
   0x5   :  { %v712_v7 = vld [vmem:[%s1067_s1 + $0x30] sm:$0xff]  ;;  %v720_v8 = vld [vmem:[%s1067_s1 + $0x40] sm:$0xff]  ;;  %v26_v9 = vld [vmem:[%s1067_s1 + $0x38] sm:$0xff] }
   0x6   :  { %v728_v10 = vld [vmem:[%s1067_s1 + $0x48] sm:$0xff]  ;;  %v735_v11 = vld [vmem:[%s1067_s1 + $0x58] sm:$0xff]  ;;  %v29_v12 = vld [vmem:[%s1067_s1 + $0x50] sm:$0xff] }
   0x7   :  { %v743_v13 = vld [vmem:[%s1067_s1 + $0x60] sm:$0xff]  ;;  %v750_v14 = vld [vmem:[%s1067_s1 + $0x70] sm:$0xff]  ;;  %v32_v15 = vld [vmem:[%s1067_s1 + $0x68] sm:$0xff] }
   0x8   :  { %v758_v16 = vld [vmem:[%s1067_s1 + $0x78] sm:$0xff]  ;;  %v36_v17 = vld [vmem:[%s1068_s2 + $0x8] sm:$0xff]  ;;  %v35_v18 = vld [vmem:[%s1068_s2] sm:$0xff] }
   0x9   :  { %v39_v20 = vld [vmem:[%s1068_s2 + $0x20] sm:$0xff]  ;;  %v38_v21 = vld [vmem:[%s1068_s2 + $0x18] sm:$0xff]  ;;  %v41_v23 = vld [vmem:[%s1068_s2 + $0x30] sm:$0xff] }
   0xa   :  { %78 = vperm.xlu2 %611, %v702_v5   ;;  %v42_v22 = vld [vmem:[%s1068_s2 + $0x38] sm:$0xff]  ;;  %v45_v24 = vld [vmem:[%s1068_s2 + $0x50] sm:$0xff]  ;;  %v44_v25 = vld [vmem:[%s1068_s2 + $0x48] sm:$0xff] }
   0xb   :  { %68 = vperm.xlu1 %610, %v707_v6   ;;  %269 = vperm.xlu0 %613, %v712_v7   ;;  %v48_v26 = vld [vmem:[%s1068_s2 + $0x68] sm:$0xff]  ;;  %v47_v27 = vld [vmem:[%s1068_s2 + $0x60] sm:$0xff]  ;;  %v50_v29 = vld [vmem:[%s1068_s2 + $0x78] sm:$0xff] }
   0xc   :  { %v19_v28 = vld [vmem:[%s1067_s1] sm:$0xff]  ;;  %v37_v36 = vld [vmem:[%s1068_s2 + $0x10] sm:$0xff]  ;;  %v40_v40 = vld [vmem:[%s1068_s2 + $0x28] sm:$0xff] }
   0xd   :  { %v842_v44 = vld [vmem:[%s1066_s0] sm:$0x7]  ;;  %v46_v52 = vld [vmem:[%s1068_s2 + $0x58] sm:$0xff]  ;;  %v49_v58 = vld [vmem:[%s1068_s2 + $0x70] sm:$0xff] }
   0xe   :  { %v845_v45 = vperm.slane %v842_v44, 0  ;;  %v43_v46 = vld [vmem:[%s1068_s2 + $0x40] sm:$0xff] }
  0x12   :  { %93 = vperm.xlu2 %611, %v720_v8  }
  0x13   :  { %88 = vperm.xlu1 %610, %v26_v9   ;;  %281 = vperm.xlu0 %613, %v728_v10  }
  0x1a   :  { %108 = vperm.xlu2 %611, %v735_v11  }
  0x1b   :  { %103 = vperm.xlu1 %610, %v29_v12   ;;  %293 = vperm.xlu0 %613, %v743_v13  }
  0x22   :  { %123 = vperm.xlu2 %611, %v750_v14  }
  0x23   :  { %118 = vperm.xlu1 %610, %v32_v15   ;;  %305 = vperm.xlu0 %613, %v758_v16  }
  0x2a   :  { %155 = vperm.xlu2 %611, %v36_v17   ;;  %v456_v17 = vld [vmem:[%s1069_s3 + $0x10] sm:$0xff] }
  0x2b   :  { %150 = vperm.xlu1 %610, %v35_v18   ;;  %617 = vset.pattern.permute.xlu0 %v651_v19 }
  0x2c   :  { %350 = vperm.xlu0 %617, %v686_v1  }
  0x32   :  { %170 = vperm.xlu2 %611, %v39_v20  }
  0x33   :  { %165 = vperm.xlu1 %610, %v38_v21  }
  0x34   :  { %370 = vperm.xlu0 %617, %v26_v9  }
  0x3a   :  { %185 = vperm.xlu2 %611, %v42_v22   ;;  %v465_v22 = vld [vmem:[%s1069_s3 + $0x58] sm:$0xff] }
  0x3b   :  { %180 = vperm.xlu1 %610, %v41_v23   ;;  %v457_v23 = vld [vmem:[%s1069_s3 + $0x18] sm:$0xff] }
  0x3c   :  { %382 = vperm.xlu0 %617, %v29_v12  }
  0x42   :  { %200 = vperm.xlu2 %611, %v45_v24  }
  0x43   :  { %195 = vperm.xlu1 %610, %v44_v25  }
  0x44   :  { %394 = vperm.xlu0 %617, %v32_v15  }
  0x4a   :  { %215 = vperm.xlu2 %611, %v48_v26  }
  0x4b   :  { %210 = vperm.xlu1 %610, %v47_v27  }
  0x4c   :  { %618 = vset.pattern.permute.xlu0 %v650_v4 }
  0x4d   :  { %53 = vperm.xlu0 %618, %v19_v28  }
  0x52   :  { %612 = vset.pattern.permute.xlu2 %v649_v3 }
  0x53   :  { %225 = vperm.xlu1 %610, %v50_v29   ;;  %245 = vperm.xlu2 %612, %v19_v28  }
  0x55   :  { %58 = vperm.xlu0 %618, %v691_v2  }
  0x5b   :  { %614 = vset.pattern.permute.xlu1 %v649_v3  ;;  %257 = vperm.xlu2 %612, %v707_v6  }
  0x5c   :  { %253 = vperm.xlu1 %614, %v686_v1   ;;  %v74_v30 = vpop.permute.xlu2 %73 }
  0x5d   :  { %83 = vperm.xlu0 %618, %v712_v7   ;;  %v136_v47 = vmul.f32 %v845_v45, %v74_v30  ;;  %v468_v30 = vld [vmem:[%s1069_s3 + $0x70] sm:$0xff] }
  0x63   :  { %265 = vperm.xlu2 %612, %v702_v5  }
  0x64   :  { %261 = vperm.xlu1 %614, %v681_v0   ;;  %v808_v31 = vpop.permute.xlu2 %78 }
  0x65   :  { %98 = vperm.xlu0 %618, %v728_v10  }
  0x6b   :  { %277 = vperm.xlu2 %612, %v720_v8  }
  0x6c   :  { %273 = vperm.xlu1 %614, %v26_v9   ;;  %v812_v32 = vpop.permute.xlu2 %93  ;;  %v459_v9 = vld [vmem:[%s1069_s3 + $0x28] sm:$0xff] }
  0x6d   :  { %113 = vperm.xlu0 %618, %v743_v13  }
  0x73   :  { %289 = vperm.xlu2 %612, %v735_v11  }
  0x74   :  { %285 = vperm.xlu1 %614, %v29_v12   ;;  %v816_v33 = vpop.permute.xlu2 %108 }
  0x75   :  { %v818_v34 = vpop.permute.xlu1 %63  ;;  %v820_v35 = vpop.permute.xlu0 %249  ;;  %128 = vperm.xlu0 %618, %v758_v16  }
  0x7b   :  { %301 = vperm.xlu2 %612, %v750_v14  }
  0x7c   :  { %297 = vperm.xlu1 %614, %v32_v15   ;;  %v827_v37 = vpop.permute.xlu2 %123  ;;  %v455_v15 = vld [vmem:[%s1069_s3 + $0x8] sm:$0xff] }
  0x7d   :  { %v69_v38 = vpop.permute.xlu1 %68  ;;  %v829_v39 = vpop.permute.xlu0 %269  ;;  %160 = vperm.xlu0 %618, %v37_v36   ;;  %v460_v36 = vld [vmem:[%s1069_s3 + $0x30] sm:$0xff] }
  0x83   :  { %616 = vset.pattern.permute.xlu2 %v651_v19 }
  0x84   :  { %615 = vset.pattern.permute.xlu1 %v651_v19  ;;  %v834_v41 = vpop.permute.xlu2 %155  ;;  %346 = vperm.xlu2 %616, %v691_v2   ;;  %v135_v2 = vmul.f32 %v845_v45, %v69_v38  ;;  %v461_v38 = vld [vmem:[%s1069_s3 + $0x38] sm:$0xff] }
  0x85   :  { %v89_v42 = vpop.permute.xlu1 %88  ;;  %v837_v43 = vpop.permute.xlu0 %281  ;;  %175 = vperm.xlu0 %618, %v40_v40   ;;  %342 = vperm.xlu1 %615, %v19_v28  }
  0x86   :  { %v139_v53 = vmul.f32 %v845_v45, %v89_v42 }
  0x8c   :  { %v171_v48 = vpop.permute.xlu2 %170  ;;  %358 = vperm.xlu2 %616, %v681_v0   ;;  %v454_v0 = vld [vmem:[%s1069_s3] sm:$0xff] }
  0x8d   :  { %v852_v49 = vadd.f32 %v171_v48, %v136_v47  ;;  %v104_v50 = vpop.permute.xlu1 %103  ;;  %v854_v51 = vpop.permute.xlu0 %293  ;;  %190 = vperm.xlu0 %618, %v43_v46   ;;  %354 = vperm.xlu1 %615, %v707_v6  }
  0x8e   :  { %v142_v59 = vmul.f32 %v845_v45, %v104_v50 }
  0x94   :  { %v186_v54 = vpop.permute.xlu2 %185  ;;  %366 = vperm.xlu2 %616, %v712_v7  }
  0x95   :  { %v862_v55 = vadd.f32 %v186_v54, %v139_v53  ;;  %v119_v56 = vpop.permute.xlu1 %118  ;;  %v864_v57 = vpop.permute.xlu0 %305  ;;  %205 = vperm.xlu0 %618, %v46_v52   ;;  %362 = vperm.xlu1 %615, %v702_v5   ;;  %v463_v53 = vld [vmem:[%s1069_s3 + $0x48] sm:$0xff]  ;;  %v464_v54 = vld [vmem:[%s1069_s3 + $0x50] sm:$0xff] }
  0x96   :  { %v145_v1 = vmul.f32 %v845_v45, %v119_v56 }
  0x9c   :  { %v201_v60 = vpop.permute.xlu2 %200  ;;  %378 = vperm.xlu2 %616, %v728_v10  }
  0x9d   :  { %v872_v61 = vadd.f32 %v201_v60, %v142_v59  ;;  %v151_v62 = vpop.permute.xlu1 %150  ;;  %220 = vperm.xlu0 %618, %v49_v58   ;;  %374 = vperm.xlu1 %615, %v720_v8  }
  0x9e   :  { %v875_v63 = vpop.permute.xlu0 %350 }
  0xa4   :  { %v216_v3 = vpop.permute.xlu2 %215  ;;  %390 = vperm.xlu2 %616, %v743_v13  }
  0xa5   :  { %v883_v5 = vadd.f32 %v216_v3, %v145_v1  ;;  %v166_v6 = vpop.permute.xlu1 %165  ;;  %472 = vperm.xlu0 %618, %v454_v0   ;;  %386 = vperm.xlu1 %615, %v735_v11   ;;  %v462_v11 = vld [vmem:[%s1069_s3 + $0x40] sm:$0xff]  ;;  %v467_v1 = vld [vmem:[%s1069_s3 + $0x68] sm:$0xff] }
  0xa6   :  { %v231_v7 = vadd.f32 %v166_v6, %v135_v2  ;;  %v886_v8 = vpop.permute.xlu0 %370  ;;  %v466_v0 = vld [vmem:[%s1069_s3 + $0x60] sm:$0xff] }
  0xac   :  { %402 = vperm.xlu2 %616, %v758_v16   ;;  %v905_v16 = vperm.slane %v842_v44, 1 }
  0xad   :  { %v181_v10 = vpop.permute.xlu1 %180  ;;  %497 = vperm.xlu0 %618, %v459_v9   ;;  %398 = vperm.xlu1 %615, %v750_v14   ;;  %v246_v12 = vpop.permute.xlu2 %245 }
  0xae   :  { %v893_v13 = vpop.permute.xlu0 %382  ;;  %v309_v27 = vmul.f32 %v905_v16, %v246_v12  ;;  %v310_v50 = vmul.f32 %v905_v16, %v820_v35 }
  0xb4   :  { %620 = vset.pattern.permute.xlu2 %v650_v4 }
  0xb5   :  { %v196_v14 = vpop.permute.xlu1 %195  ;;  %512 = vperm.xlu0 %618, %v462_v11   ;;  %619 = vset.pattern.permute.xlu1 %v650_v4  ;;  %v258_v18 = vpop.permute.xlu2 %257  ;;  %v458_v4 = vld [vmem:[%s1069_s3 + $0x20] sm:$0xff] }
  0xb6   :  { %v909_v19 = vpop.permute.xlu0 %394  ;;  %477 = vperm.xlu1 %619, %v455_v15   ;;  %482 = vperm.xlu2 %620, %v456_v17   ;;  %v312_v20 = vmul.f32 %v905_v16, %v258_v18  ;;  %v469_v15 = vld [vmem:[%s1069_s3 + $0x78] sm:$0xff]  ;;  %v980_v18 = vperm.slane %v842_v44, 2  ;;  %s652_s3 = smov [#allocation2]  }
  0xb7   :  { %s595_s29 = sshll.u32 %s652_s3, 4  ;;  %s596_s29 = int_to_ptr.vmem [resolvable:$true] %s595_s29 }
  0xb8   :  { %v912_v21 = vadd.f32 %v312_v20, %v231_v7 }
  0xbd   :  { %v211_v24 = vpop.permute.xlu1 %210  ;;  %527 = vperm.xlu0 %618, %v465_v22   ;;  %v923_v25 = vpop.permute.xlu2 %265 }
  0xbe   :  { %487 = vperm.xlu1 %619, %v457_v23   ;;  %492 = vperm.xlu2 %620, %v458_v4   ;;  %v321_v4 = vmul.f32 %v905_v16, %v854_v51  ;;  %v324_v51 = vmul.f32 %v905_v16, %v864_v57 }
  0xbf   :  { %v54_v26 = vpop.permute.xlu0 %53 }
  0xc0   :  { %v132_v28 = vmul.f32 %v845_v45, %v54_v26 }
  0xc2   :  { %v228_v29 = vadd.f32 %v151_v62, %v132_v28 }
  0xc4   :  { %v936_v40 = vadd.f32 %v309_v27, %v228_v29 }
  0xc5   :  { %v226_v42 = vpop.permute.xlu1 %225  ;;  %542 = vperm.xlu0 %618, %v468_v30   ;;  %v938_v46 = vpop.permute.xlu2 %277 }
  0xc6   :  { %502 = vperm.xlu1 %619, %v460_v36   ;;  %507 = vperm.xlu2 %620, %v461_v38  }
  0xc7   :  { %v59_v47 = vpop.permute.xlu0 %58 }
  0xc8   :  { %v133_v48 = vmul.f32 %v845_v45, %v59_v47 }
  0xca   :  { %v229_v52 = vadd.f32 %v834_v41, %v133_v48  ;;  %v315_v41 = vmul.f32 %v905_v16, %v829_v39 }
  0xcc   :  { %v950_v56 = vadd.f32 %v310_v50, %v229_v52  ;;  %v134_v50 = vmul.f32 %v845_v45, %v818_v34 }
  0xcd   :  { %v952_v60 = vpop.permute.xlu2 %289 }
  0xce   :  { %v254_v58 = vpop.permute.xlu1 %253  ;;  %517 = vperm.xlu1 %619, %v463_v53   ;;  %522 = vperm.xlu2 %620, %v464_v54  }
  0xcf   :  { %v84_v59 = vpop.permute.xlu0 %83 }
  0xd0   :  { %v138_v35 = vmul.f32 %v845_v45, %v84_v59 }
  0xd2   :  { %v234_v62 = vadd.f32 %v181_v10, %v138_v35  ;;  %v318_v10 = vmul.f32 %v905_v16, %v837_v43  ;;  %v413_v43 = vmul.f32 %v980_v18, %v886_v8  ;;  %v416_v8 = vmul.f32 %v980_v18, %v893_v13 }
  0xd3   :  { %v311_v13 = vmul.f32 %v905_v16, %v254_v58  ;;  %v314_v58 = vmul.f32 %v905_v16, %v923_v25  ;;  %v320_v25 = vmul.f32 %v905_v16, %v952_v60 }
  0xd4   :  { %v963_v2 = vadd.f32 %v315_v41, %v234_v62 }
  0xd5   :  { %v972_v12 = vpop.permute.xlu2 %301 }
  0xd6   :  { %v262_v3 = vpop.permute.xlu1 %261  ;;  %532 = vperm.xlu1 %619, %v466_v0   ;;  %537 = vperm.xlu2 %620, %v467_v1   ;;  %v137_v0 = vmul.f32 %v845_v45, %v808_v31  ;;  %v143_v31 = vmul.f32 %v845_v45, %v816_v33 }
  0xd7   :  { %v313_v6 = vmul.f32 %v905_v16, %v262_v3  ;;  %v99_v7 = vpop.permute.xlu0 %98 }
  0xd8   :  { %v141_v9 = vmul.f32 %v845_v45, %v99_v7 }
  0xd9   :  { %v968_v39 = vadd.f32 %v313_v6, %v852_v49 }
  0xda   :  { %v237_v11 = vadd.f32 %v196_v14, %v141_v9 }
  0xdc   :  { %v977_v17 = vadd.f32 %v318_v10, %v237_v11  ;;  %v317_v10 = vmul.f32 %v905_v16, %v938_v46 }
  0xde   :  { %v274_v20 = vpop.permute.xlu1 %273  ;;  %547 = vperm.xlu1 %619, %v469_v15   ;;  %v347_v44 = vpop.permute.xlu2 %346 }
  0xdf   :  { %v316_v49 = vmul.f32 %v905_v16, %v274_v20  ;;  %v114_v22 = vpop.permute.xlu0 %113  ;;  %v407_v60 = vmul.f32 %v980_v18, %v347_v44 }
  0xe0   :  { %v144_v23 = vmul.f32 %v845_v45, %v114_v22 }
  0xe1   :  { %v332_v14 = vadd.f32 %v316_v49, %v862_v55 }
  0xe2   :  { %v240_v26 = vadd.f32 %v211_v24, %v144_v23 }
  0xe3   :  { %v989_v27 = vadd.f32 %v413_v43, %v332_v14  ;;  %v146_v14 = vmul.f32 %v845_v45, %v827_v37  ;;  %v423_v37 = vadd.f32 %v407_v60, %v950_v56 }
  0xe4   :  { %v991_v28 = vadd.f32 %v321_v4, %v240_v26  ;;  %v323_v26 = vmul.f32 %v905_v16, %v972_v12 }
  0xe5   :  { %v439_v12 = vmax.f32 %v423_v37, 0.0 }
  0xe6   :  { %v286_v29 = vpop.permute.xlu1 %285  ;;  %v359_v52 = vpop.permute.xlu2 %358 }
  0xe7   :  { %v319_v30 = vmul.f32 %v905_v16, %v286_v29  ;;  %v129_v36 = vpop.permute.xlu0 %128 }
  0xe8   :  { %v147_v38 = vmul.f32 %v845_v45, %v129_v36 }
  0xe9   :  { %v335_v55 = vadd.f32 %v319_v30, %v872_v61  ;;  %v419_v61 = vmul.f32 %v980_v18, %v909_v19 }
  0xea   :  { %v243_v24 = vadd.f32 %v226_v42, %v147_v38  ;;  %v408_v42 = vmul.f32 %v980_v18, %v875_v63 }
  0xeb   :  { %v1000_v47 = vadd.f32 %v416_v8, %v335_v55 }
  0xec   :  { %v1002_v48 = vadd.f32 %v324_v51, %v243_v24 }
  0xee   :  { %v298_v53 = vpop.permute.xlu1 %297  ;;  %v367_v6 = vpop.permute.xlu2 %366 }
  0xef   :  { %v322_v54 = vmul.f32 %v905_v16, %v298_v53  ;;  %v161_v59 = vpop.permute.xlu0 %160  ;;  %v410_v53 = vmul.f32 %v980_v18, %v359_v52 }
  0xf0   :  { %v230_v35 = vadd.f32 %v161_v59, %v134_v50 }
  0xf1   :  { %v338_v57 = vadd.f32 %v322_v54, %v883_v5  ;;  %v140_v5 = vmul.f32 %v845_v45, %v812_v32 }
  0xf2   :  { %v327_v41 = vadd.f32 %v311_v13, %v230_v35 }
  0xf3   :  { %v1013_v62 = vadd.f32 %v419_v61, %v338_v57 }
  0xf4   :  { %v424_v34 = vadd.f32 %v408_v42, %v327_v41 }
  0xf6   :  { %v379_v15 = vpop.permute.xlu2 %378  ;;  %v440_v54 = vmax.f32 %v424_v34, 0.0 }
  0xf7   :  { %v176_v1 = vpop.permute.xlu0 %175  ;;  %v343_v3 = vpop.permute.xlu1 %342 }
  0xf8   :  { %v233_v7 = vadd.f32 %v176_v1, %v137_v0  ;;  %v406_v38 = vmul.f32 %v980_v18, %v343_v3  ;;  %v412_v0 = vmul.f32 %v980_v18, %v367_v6 }
  0xfa   :  { %v330_v19 = vadd.f32 %v314_v58, %v233_v7  ;;  %v422_v45 = vadd.f32 %v406_v38, %v936_v40  ;;  %v426_v40 = vadd.f32 %v410_v53, %v968_v39  ;;  %v428_v7 = vadd.f32 %v412_v0, %v963_v2 }
  0xfb   :  { %v415_v39 = vmul.f32 %v980_v18, %v379_v15 }
  0xfc   :  { %v438_v16 = vmax.f32 %v422_v45, 0.0  ;;  %v442_v52 = vmax.f32 %v426_v40, 0.0  ;;  %v444_v6 = vmax.f32 %v428_v7, 0.0 }
  0xfd   :  { %v431_v2 = vadd.f32 %v415_v39, %v977_v17 }
  0xfe   :  { %v391_v32 = vpop.permute.xlu2 %390 }
  0xff   :  { %v191_v9 = vpop.permute.xlu0 %190  ;;  %v355_v63 = vpop.permute.xlu1 %354 }
 0x100   :  { %v236_v11 = vadd.f32 %v191_v9, %v140_v5  ;;  %v409_v24 = vmul.f32 %v980_v18, %v355_v63 }
 0x102   :  { %v333_v20 = vadd.f32 %v317_v10, %v236_v11  ;;  %v425_v35 = vadd.f32 %v409_v24, %v912_v21 }
 0x104   :  { %v441_v3 = vmax.f32 %v425_v35, 0.0 }
 0x106   :  { %v1035_v33 = vpop.permute.xlu2 %402 }
 0x107   :  { %v206_v49 = vpop.permute.xlu0 %205  ;;  %v363_v22 = vpop.permute.xlu1 %362 }
 0x108   :  { %v239_v23 = vadd.f32 %v206_v49, %v143_v31  ;;  %v411_v61 = vmul.f32 %v980_v18, %v363_v22 }
 0x10a   :  { %v1027_v43 = vadd.f32 %v320_v25, %v239_v23  ;;  %v427_v1 = vadd.f32 %v411_v61, %v330_v19  ;;  %v445_v23 = vmax.f32 %v989_v27, 0.0  ;;  %v448_v27 = vmax.f32 %v1000_v47, 0.0 }
 0x10b   :  { %v451_v47 = vmax.f32 %v1013_v62, 0.0 }
 0x10c   :  { %v443_v9 = vmax.f32 %v427_v1, 0.0 }
 0x10f   :  { %v221_v4 = vpop.permute.xlu0 %220  ;;  %v375_v46 = vpop.permute.xlu1 %374 }
 0x110   :  { %v242_v29 = vadd.f32 %v221_v4, %v146_v14  ;;  %v483_v55 = vpop.permute.xlu2 %482  ;;  %v414_v5 = vmul.f32 %v980_v18, %v375_v46 }
 0x111   :  { %v552_v57 = vmul.f32 %v483_v55, %v440_v54  ;;  %v418_v55 = vmul.f32 %v980_v18, %v391_v32  ;;  %v421_v32 = vmul.f32 %v980_v18, %v1035_v33 }
 0x112   :  { %v1033_v30 = vadd.f32 %v323_v26, %v242_v29  ;;  %v430_v22 = vadd.f32 %v414_v5, %v333_v20 }
 0x113   :  { %v434_v17 = vadd.f32 %v418_v55, %v991_v28 }
 0x114   :  { %v446_v26 = vmax.f32 %v430_v22, 0.0 }
 0x117   :  { %v387_v36 = vpop.permute.xlu1 %386  ;;  %v473_v51 = vpop.permute.xlu0 %472 }
 0x118   :  { %v550_v59 = vmul.f32 %v473_v51, %v438_v16  ;;  %v493_v44 = vpop.permute.xlu2 %492  ;;  %v417_v4 = vmul.f32 %v980_v18, %v387_v36  ;;  %v447_v51 = vmax.f32 %v431_v2, 0.0 }
 0x119   :  { %v554_v21 = vmul.f32 %v493_v44, %v442_v52 }
 0x11a   :  { %v433_v20 = vadd.f32 %v417_v4, %v1027_v43 }
 0x11f   :  { %v399_v8 = vpop.permute.xlu1 %398  ;;  %v498_v56 = vpop.permute.xlu0 %497 }
 0x120   :  { %v508_v10 = vpop.permute.xlu2 %507  ;;  %v555_v11 = vmul.f32 %v498_v56, %v443_v9  ;;  %v420_v36 = vmul.f32 %v980_v18, %v399_v8  ;;  %v437_v8 = vadd.f32 %v421_v32, %v1002_v48 }
 0x121   :  { %v557_v46 = vmul.f32 %v508_v10, %v445_v23 }
 0x122   :  { %v436_v43 = vadd.f32 %v420_v36, %v1033_v30  ;;  %v453_v1 = vmax.f32 %v437_v8, 0.0 }
 0x124   :  { %v452_v56 = vmax.f32 %v436_v43, 0.0 }
 0x127   :  { %v513_v49 = vpop.permute.xlu0 %512 }
 0x128   :  { %v478_v50 = vpop.permute.xlu1 %477  ;;  %v558_v60 = vmul.f32 %v513_v49, %v446_v26  ;;  %v523_v15 = vpop.permute.xlu2 %522 }
 0x129   :  { %v551_v13 = vmul.f32 %v478_v50, %v439_v12  ;;  %v560_v12 = vmul.f32 %v523_v15, %v448_v27  ;;  %v449_v50 = vmax.f32 %v433_v20, 0.0 }
 0x12b   :  { %v566_v42 = vadd.f32 %v551_v13, %v550_v59  ;;  %v450_v13 = vmax.f32 %v434_v17, 0.0 }
 0x12d   :  { %v567_v41 = vadd.f32 %v566_v42, %v552_v57 }
 0x12f   :  { %v528_v45 = vpop.permute.xlu0 %527 }
 0x130   :  { %v488_v58 = vpop.permute.xlu1 %487  ;;  %v561_v54 = vmul.f32 %v528_v45, %v449_v50  ;;  %v538_v35 = vpop.permute.xlu2 %537 }
 0x131   :  { %v553_v34 = vmul.f32 %v488_v58, %v441_v3  ;;  %v563_v42 = vmul.f32 %v538_v35, %v451_v47 }
 0x133   :  { %v568_v63 = vadd.f32 %v567_v41, %v553_v34 }
 0x135   :  { %v569_v31 = vadd.f32 %v568_v63, %v554_v21 }
 0x137   :  { %v570_v19 = vadd.f32 %v569_v31, %v555_v11  ;;  %v543_v28 = vpop.permute.xlu0 %542 }
 0x138   :  { %v503_v25 = vpop.permute.xlu1 %502  ;;  %v564_v41 = vmul.f32 %v543_v28, %v452_v56 }
 0x139   :  { %v556_v14 = vmul.f32 %v503_v25, %v444_v6 }
 0x13b   :  { %v571_v29 = vadd.f32 %v570_v19, %v556_v14 }
 0x13d   :  { %v572_v38 = vadd.f32 %v571_v29, %v557_v46 }
 0x13f   :  { %v573_v37 = vadd.f32 %v572_v38, %v558_v60 }
 0x140   :  { %v518_v24 = vpop.permute.xlu1 %517 }
 0x141   :  { %v559_v16 = vmul.f32 %v518_v24, %v447_v51 }
 0x143   :  { %v574_v53 = vadd.f32 %v573_v37, %v559_v16 }
 0x145   :  { %v575_v59 = vadd.f32 %v574_v53, %v560_v12 }
 0x147   :  { %v576_v44 = vadd.f32 %v575_v59, %v561_v54 }
 0x148   :  { %v533_v61 = vpop.permute.xlu1 %532 }
 0x149   :  { %v562_v57 = vmul.f32 %v533_v61, %v450_v13 }
 0x14b   :  { %v577_v40 = vadd.f32 %v576_v44, %v562_v57 }
 0x14d   :  { %v578_v0 = vadd.f32 %v577_v40, %v563_v42 }
 0x14f   :  { %v579_v3 = vadd.f32 %v578_v0, %v564_v41 }
 0x150   :  { %v548_v18 = vpop.permute.xlu1 %547 }
 0x151   :  { %v565_v33 = vmul.f32 %v548_v18, %v453_v1 }
 0x153   :  { %v580_v30 = vadd.f32 %v579_v3, %v565_v33 }
 0x155   :  { %v581_v58 = vrot.slane %v580_v30, 4 }
 0x157   :  { %v582_v52 = vadd.f32 %v581_v58, %v580_v30 }
 0x159   :  { %v583_v34 = vrot.slane %v582_v52, 2 }
 0x15b   :  { %v584_v7 = vadd.f32 %v583_v34, %v582_v52 }
 0x15d   :  { %v585_v5 = vrot.slane %v584_v7, 1 }
 0x15f   :  { %v586_v62 = vadd.f32 %v585_v5, %v584_v7 }
 0x161   :  { %621 = vtanh.f32 %v586_v62 }
 0x167   :  { %v622_v48 = vpop.eup %621 }
 0x168   :  { %v588_v21 = vmul.f32 2.0, %v622_v48 }
 0x16a   :  { %589 = vst [vmem:[#allocation2] sm:$0x1] %v588_v21 }
 0x16b   :  { %600 = dma.vmem_to_hbm [thread:$0]  %s596_s29, 16, %s598_s6, [#allocation3]  }
 0x16c   :  { %647 = dma.done.wait [#allocation3], 16  }
 0x16d   :  { %648 = vsyncadd [#allocation3], 4294967280 }
 0x16e   :  { %605 = vsyncpa [#allocation3], 1 }

</bundles_post_ra>
